<compile_context>
chip_gen: v5e
topology: v5e:2x2
jax: 0.10.0
libtpu: 0.0.40
codegen_flags: <defaults>
</compile_context>

<pallas_src>
import functools
import math

import jax
import jax.numpy as jnp
from jax import lax
from jax.experimental import pallas as pl
from jax.experimental.pallas import tpu as pltpu

EPS = 1e-6
LN10 = math.log(10.0)
_VMEM_LIMIT = 32 * 1024 * 1024


def _round_up(x, m):
    return ((x + m - 1) // m) * m


def _mosaic_params(**kwargs):
    cls = getattr(pltpu, "CompilerParams", None)
    if cls is None:  # older jax fallback
        cls = getattr(pltpu, "TPUCompilerParams")
    return cls(**kwargs)


# ---------------------------------------------------------------------------
# Kernel 1: merged STFT of all 4 channels as one bf16 MXU matmul.
#   frames : (Rp, win_len) bf16  -- channel-major stacked rows, zero padded
#   basis  : (win_len, Npad) bf16 -- [hann*cos | hann*sin | 0...], Npad % 128 == 0
#   out    : (Rp, Npad) f32       -- lane-dense store; re in [0:F), im in [F:2F)
# ---------------------------------------------------------------------------
def _stft_matmul_kernel(frames_ref, basis_ref, out_ref):
    out_ref[...] = jnp.dot(frames_ref[...], basis_ref[...],
                           preferred_element_type=jnp.float32)


def stft_all_pallas(frames2d, basis, *, row_tile=128):
    rows_p, w = frames2d.shape
    _, npad = basis.shape
    return pl.pallas_call(
        _stft_matmul_kernel,
        out_shape=jax.ShapeDtypeStruct((rows_p, npad), jnp.float32),
        grid=(rows_p // row_tile,),
        in_specs=[pl.BlockSpec((row_tile, w), lambda i: (i, 0)),
                  pl.BlockSpec((w, npad), lambda i: (0, 0))],
        out_specs=pl.BlockSpec((row_tile, npad), lambda i: (i, 0)),
        compiler_params=_mosaic_params(
            dimension_semantics=("parallel",),
            vmem_limit_bytes=_VMEM_LIMIT),
    )(frames2d, basis)


def _stft_basis(win_len, fft_len, npad):
    """Real-DFT basis with the periodic Hann window folded in, padded to npad lanes."""
    F = fft_len // 2 + 1
    n = jnp.arange(win_len, dtype=jnp.float32)
    window = 0.5 - 0.5 * jnp.cos(2.0 * jnp.pi * n / win_len)
    k = jnp.arange(F, dtype=jnp.float32)
    ang = -2.0 * jnp.pi * n[:, None] * k[None, :] / float(fft_len)
    basis = jnp.zeros((win_len, npad), jnp.float32)
    basis = basis.at[:, :F].set(window[:, None] * jnp.cos(ang))
    basis = basis.at[:, F:2 * F].set(window[:, None] * jnp.sin(ang))
    return basis.astype(jnp.bfloat16)


def _frame_signals(x_all, win_len, hop):
    """x_all: (4, B, T) -> frames (4, B, nf, win_len).  No gather when hop | win_len
    (frames built from slices of a no-copy reshape); gather fallback otherwise."""
    _, B, T = x_all.shape
    nf = (T - win_len) // hop + 1
    if win_len % hop == 0:
        r = win_len // hop
        nchunks = T // hop
        y = x_all[:, :, :nchunks * hop].reshape(4, B, nchunks, hop)
        frames = jnp.concatenate([y[:, :, p:p + nf, :] for p in range(r)], axis=-1)
    else:
        idx = jnp.arange(nf)[:, None] * hop + jnp.arange(win_len)[None, :]
        frames = x_all[:, :, idx]
    return frames, nf


# ---------------------------------------------------------------------------
# Kernel 2: masked ILD / IPD reductions, accumulated per batch across frame tiles.
#   inputs : 8 planes (B, nfp, F) f32 (target/output L/R re/im) + mask (B, nfp, F)
#   outputs: ild_sum, ipd_sum, mask_sum each (B, 1, 128) f32 (scalar broadcast)
# ---------------------------------------------------------------------------
def _binaural_spectral_kernel(tlr_ref, tli_ref, trr_ref, tri_ref,
                              olr_ref, oli_ref, orr_ref, ori_ref, mask_ref,
                              ild_ref, ipd_ref, cnt_ref):
    t = pl.program_id(1)

    @pl.when(t == 0)
    def _init():
        ild_ref[...] = jnp.zeros_like(ild_ref)
        ipd_ref[...] = jnp.zeros_like(ipd_ref)
        cnt_ref[...] = jnp.zeros_like(cnt_ref)

    tlr, tli = tlr_ref[...], tli_ref[...]
    trr, tri = trr_ref[...], tri_ref[...]
    olr, oli = olr_ref[...], oli_ref[...]
    orr, ori = orr_ref[...], ori_ref[...]
    m = mask_ref[...]

    # --- ILD (dB), sqrt-free: 20*log10(|s|+EPS) ~= 10*log10(|s|^2 + EPS^2);
    #     one log per channel pair via the ratio.
    e2 = EPS * EPS
    p_tl = tlr * tlr + tli * tli + e2
    p_tr = trr * trr + tri * tri + e2
    p_ol = olr * olr + oli * oli + e2
    p_or = orr * orr + ori * ori + e2
    t_ild = (10.0 / LN10) * jnp.log(p_tl / p_tr)
    o_ild = (10.0 / LN10) * jnp.log(p_ol / p_or)
    ild_d = jnp.abs(t_ild - o_ild)

    # --- IPD (rad): angle((L+eps)/(R+eps)) == atan2(b*c - a*d, a*c + b*d)
    ta, tb, tc, td = tlr + EPS, tli, trr + EPS, tri
    oa, ob, oc, od = olr + EPS, oli, orr + EPS, ori
    t_ipd = jnp.arctan2(tb * tc - ta * td, ta * tc + tb * td)
    o_ipd = jnp.arctan2(ob * oc - oa * od, oa * oc + ob * od)
    ipd_d = jnp.abs(t_ipd - o_ipd)

    ild_ref[...] += jnp.sum(ild_d * m)
    ipd_ref[...] += jnp.sum(ipd_d * m)
    cnt_ref[...] += jnp.sum(m)


def binaural_spectral_pallas(planes, mask, *, frame_tile):
    B, nfp, F = mask.shape
    grid = (B, nfp // frame_tile)
    spec_in = pl.BlockSpec((1, frame_tile, F), lambda b, t: (b, t, 0))
    spec_out = pl.BlockSpec((1, 1, 128), lambda b, t: (b, 0, 0))
    out_shape = tuple(jax.ShapeDtypeStruct((B, 1, 128), jnp.float32) for _ in range(3))
    ild_s, ipd_s, cnt_s = pl.pallas_call(
        _binaural_spectral_kernel,
        out_shape=out_shape,
        grid=grid,
        in_specs=[spec_in] * 9,
        out_specs=(spec_out, spec_out, spec_out),
        compiler_params=_mosaic_params(
            dimension_semantics=("parallel", "arbitrary"),
            vmem_limit_bytes=_VMEM_LIMIT),
    )(*planes, mask)
    return ild_s[:, 0, 0], ipd_s[:, 0, 0], cnt_s[:, 0, 0]


# ---------------------------------------------------------------------------
# Speech mask (glue): max / compare, data-dependent fallback via lax.top_k.
# mag_avg_db layout: (batch, time_frames, freq) -> max over time is axis=1.
# ---------------------------------------------------------------------------
def _speech_mask(mag_avg_db, threshold=20.0, min_active_ratio=0.1):
    B, T, F = mag_avg_db.shape
    max_db_per_freq = jnp.max(mag_avg_db, axis=1, keepdims=True)
    mask = (mag_avg_db >= max_db_per_freq - threshold).astype(jnp.float32)

    total_bins = float(T * F)
    active_bins = jnp.sum(mask, axis=(1, 2))

    kth = int(min_active_ratio * total_bins)  # same index as the reference sort
    topk_vals, _ = lax.top_k(mag_avg_db.reshape(B, -1), kth + 1)
    new_threshold = topk_vals[:, kth]
    fallback = (mag_avg_db >= new_threshold[:, None, None]).astype(jnp.float32)

    use_fb = (active_bins < min_active_ratio * total_bins)[:, None, None]
    return jnp.where(use_fb, fallback, mask)


# ---------------------------------------------------------------------------
# BinauralLoss forward.
# ---------------------------------------------------------------------------
def binaural_loss(model_output, targets, *,
                  win_len=64, win_inc=16, fft_len=64,
                  ild_weight=1.0, ipd_weight=10.0,
                  stoi_weight=0.0,          # TODO(synk): NegSTOILoss not implemented
                  snr_loss_weight=1.0,
                  frame_tile=128, row_tile=128):
    model_output = model_output.astype(jnp.float32)
    targets = targets.astype(jnp.float32)
    B = targets.shape[0]
    hop = win_inc
    F = fft_len // 2 + 1
    npad = _round_up(2 * F, 128)

    loss = jnp.float32(0.0)

    # --- SNR term (XLA glue; trivially fused reduction, no dedicated kernel) ---
    if snr_loss_weight > 0:
        noise = model_output - targets
        te = jnp.sum(targets * targets, axis=-1) + 1e-8   # (B, 2)
        ne = jnp.sum(noise * noise, axis=-1) + 1e-8
        snr_db = 10.0 * (jnp.log(te / ne) / LN10)
        snr_l = -jnp.mean(snr_db[:, 0])                   # snr_loss() == -mean(snr)
        snr_r = -jnp.mean(snr_db[:, 1])
        snr_loss_lr = -(snr_l + snr_r) / 2.0              # reference's sign kept as-is
        loss = loss + snr_loss_weight * snr_loss_lr

    # --- STOI term ---
    # TODO(synk): NegSTOILoss (torch_stoi) has no clean Pallas equivalent.

    if ild_weight <= 0 and ipd_weight <= 0:
        return loss

    # --- merged STFT of all 4 channels (one Pallas matmul) ---
    x_all = jnp.stack([targets[:, 0], targets[:, 1],
                       model_output[:, 0], model_output[:, 1]], axis=0)  # (4,B,T)
    frames, nf = _frame_signals(x_all, win_len, hop)      # (4,B,nf,w); window in basis

    tt = min(frame_tile, _round_up(nf, 8))                # frame tile for kernel 2
    nfp = _round_up(nf, tt)
    frames = jnp.pad(frames, ((0, 0), (0, 0), (0, nfp - nf), (0, 0)))
    rows = 4 * B * nfp
    rows_p = _round_up(rows, row_tile)
    frames2d = frames.reshape(rows, win_len)
    frames2d = jnp.pad(frames2d, ((0, rows_p - rows), (0, 0))).astype(jnp.bfloat16)

    basis = _stft_basis(win_len, fft_len, npad)
    spec = stft_all_pallas(frames2d, basis, row_tile=row_tile)   # (rows_p, npad) f32
    spec = spec[:rows].reshape(4, B, nfp, npad)                  # (ch, B, time, lanes)

    re = spec[..., :F]           # (4, B, nfp, F)
    im = spec[..., F:2 * F]

    # --- speech mask (glue; fused by XLA under jit) ---
    p_tl = re[0, :, :nf] ** 2 + im[0, :, :nf] ** 2
    p_tr = re[1, :, :nf] ** 2 + im[1, :, :nf] ** 2
    # (20log10(|L|+1e-12) + 20log10(|R|+1e-12))/2  ~=  5log10(|L|^2+1e-24)+5log10(|R|^2+1e-24)
    mag_avg_db = 5.0 * ((jnp.log(p_tl + 1e-24) + jnp.log(p_tr + 1e-24)) / LN10)
    mask = _speech_mask(mag_avg_db, threshold=20.0)
    mask = jnp.pad(mask, ((0, 0), (0, nfp - nf), (0, 0)))   # zero the padded frames

    # --- masked ILD / IPD reductions (Pallas) ---
    planes = (re[0], im[0], re[1], im[1], re[2], im[2], re[3], im[3])
    ild_sum, ipd_sum, mask_sum = binaural_spectral_pallas(planes, mask, frame_tile=tt)

    if ild_weight > 0:
        loss = loss + ild_weight * jnp.mean(ild_sum / mask_sum)
    if ipd_weight > 0:
        loss = loss + ipd_weight * jnp.mean(ipd_sum / mask_sum)
    return loss


if __name__ == "__main__":
    key = jax.random.PRNGKey(0)
    k1, k2 = jax.random.split(key)

    B, C, T = 2, 2, 512  # batch, binaural channels, samples
    targets = jax.random.normal(k1, (B, C, T), dtype=jnp.float32)
    model_output = targets + 0.1 * jax.random.normal(k2, (B, C, T), dtype=jnp.float32)

    loss_fn = jax.jit(functools.partial(
        binaural_loss,
        win_len=64, win_inc=16, fft_len=64,
        ild_weight=1.0, ipd_weight=10.0, stoi_weight=0.0, snr_loss_weight=1.0,
        frame_tile=16, row_tile=128))   # small tiles so the toy shapes exercise multi-step grids

    loss = loss_fn(model_output, targets)
    loss = jax.block_until_ready(loss)

    assert jnp.isfinite(loss), f"loss is not finite: {loss}"
    print("KERNEL_OK")
</pallas_src>

<mosaic_0001>
module attributes {stable_mosaic.version = 11 : i64} {
  func.func @_stft_matmul_kernel(%arg0: i32, %arg1: memref<128x64xbf16, #tpu.memory_space<vmem>>, %arg2: memref<64x128xbf16, #tpu.memory_space<vmem>>, %arg3: memref<128x128xf32, #tpu.memory_space<vmem>>) attributes {dimension_semantics = [#tpu.dimension_semantics<parallel>], iteration_bounds = array<i64: 2>, scalar_prefetch = 0 : i64, scratch_operands = 0 : i64, tpu.core_type = #tpu.core_type<tc>, window_params = [{transform_indices = @transform_0, window_bounds = array<i64: 128, 64>}, {pipeline_mode = #tpu.pipeline_mode<synchronous>, transform_indices = @transform_1, window_bounds = array<i64: 64, 128>}, {transform_indices = @transform_2, window_bounds = array<i64: 128, 128>}]} {
    %c0 = arith.constant 0 : index
    %c0_0 = arith.constant 0 : index
    %0 = vector.load %arg1[%c0, %c0_0] : memref<128x64xbf16, #tpu.memory_space<vmem>>, vector<128x64xbf16>
    %c0_1 = arith.constant 0 : index
    %c0_2 = arith.constant 0 : index
    %1 = vector.load %arg2[%c0_1, %c0_2] : memref<64x128xbf16, #tpu.memory_space<vmem>>, vector<64x128xbf16>
    %cst = arith.constant dense<0.000000e+00> : vector<128x128xf32>
    %2 = tpu.matmul %0, %1, %cst {dimension_numbers = #tpu.dot_dimension_numbers<[1], [0], [0], [1], [0, 0, 1, 1], [], []>} : vector<128x64xbf16>, vector<64x128xbf16>, vector<128x128xf32> -> vector<128x128xf32>
    %c0_3 = arith.constant 0 : index
    %c0_4 = arith.constant 0 : index
    %3 = vector.load %arg3[%c0_3, %c0_4] : memref<128x128xf32, #tpu.memory_space<vmem>>, vector<128x128xf32>
    tpu.vector_store %arg3[%c0_3, %c0_4], %2 {strides = array<i32>} : memref<128x128xf32, #tpu.memory_space<vmem>>, vector<128x128xf32>,
    return
  }
  func.func @transform_0(%arg0: i32) -> (i32, i32) {
    %c0_i32 = arith.constant 0 : i32
    %c0_i32_0 = arith.constant 0 : i32
    return %arg0, %c0_i32 : i32, i32
  }
  func.func @transform_1(%arg0: i32) -> (i32, i32) {
    %c0_i32 = arith.constant 0 : i32
    %c0_i32_0 = arith.constant 0 : i32
    %c0_i32_1 = arith.constant 0 : i32
    return %c0_i32, %c0_i32_0 : i32, i32
  }
  func.func @transform_2(%arg0: i32) -> (i32, i32) {
    %c0_i32 = arith.constant 0 : i32
    %c0_i32_0 = arith.constant 0 : i32
    return %arg0, %c0_i32 : i32, i32
  }
}

module attributes {stable_mosaic.version = 11 : i64} {
  func.func @_binaural_spectral_kernel(%arg0: i32, %arg1: i32, %arg2: memref<1x16x33xf32, #tpu.memory_space<vmem>>, %arg3: memref<1x16x33xf32, #tpu.memory_space<vmem>>, %arg4: memref<1x16x33xf32, #tpu.memory_space<vmem>>, %arg5: memref<1x16x33xf32, #tpu.memory_space<vmem>>, %arg6: memref<1x16x33xf32, #tpu.memory_space<vmem>>, %arg7: memref<1x16x33xf32, #tpu.memory_space<vmem>>, %arg8: memref<1x16x33xf32, #tpu.memory_space<vmem>>, %arg9: memref<1x16x33xf32, #tpu.memory_space<vmem>>, %arg10: memref<1x16x33xf32, #tpu.memory_space<vmem>>, %arg11: memref<1x1x128xf32, #tpu.memory_space<vmem>>, %arg12: memref<1x1x128xf32, #tpu.memory_space<vmem>>, %arg13: memref<1x1x128xf32, #tpu.memory_space<vmem>>) attributes {dimension_semantics = [#tpu.dimension_semantics<parallel>, #tpu.dimension_semantics<arbitrary>], iteration_bounds = array<i64: 2, 2>, scalar_prefetch = 0 : i64, scratch_operands = 0 : i64, tpu.core_type = #tpu.core_type<tc>, window_params = [{transform_indices = @transform_0, window_bounds = array<i64: 1, 16, 33>}, {transform_indices = @transform_1, window_bounds = array<i64: 1, 16, 33>}, {transform_indices = @transform_2, window_bounds = array<i64: 1, 16, 33>}, {transform_indices = @transform_3, window_bounds = array<i64: 1, 16, 33>}, {transform_indices = @transform_4, window_bounds = array<i64: 1, 16, 33>}, {transform_indices = @transform_5, window_bounds = array<i64: 1, 16, 33>}, {transform_indices = @transform_6, window_bounds = array<i64: 1, 16, 33>}, {transform_indices = @transform_7, window_bounds = array<i64: 1, 16, 33>}, {transform_indices = @transform_8, window_bounds = array<i64: 1, 16, 33>}, {transform_indices = @transform_9, window_bounds = array<i64: 1, 1, 128>}, {transform_indices = @transform_10, window_bounds = array<i64: 1, 1, 128>}, {transform_indices = @transform_11, window_bounds = array<i64: 1, 1, 128>}]} {
    %c0_i32 = arith.constant 0 : i32
    %0 = arith.cmpi eq, %arg1, %c0_i32 : i32
    %1 = arith.extui %0 : i1 to i32
    %c0_i32_0 = arith.constant 0 : i32
    %2 = arith.cmpi ne, %1, %c0_i32_0 : i32
    scf.if %2 {
      %cst_57 = arith.constant 0.000000e+00 : f32
      %92 = vector.broadcast %cst_57 : f32 to vector<1x1x128xf32>
      %c0_58 = arith.constant 0 : index
      %c0_59 = arith.constant 0 : index
      %c0_60 = arith.constant 0 : index
      %93 = vector.load %arg11[%c0_58, %c0_59, %c0_60] : memref<1x1x128xf32, #tpu.memory_space<vmem>>, vector<1x1x128xf32>
      tpu.vector_store %arg11[%c0_58, %c0_59, %c0_60], %92 {strides = array<i32>} : memref<1x1x128xf32, #tpu.memory_space<vmem>>, vector<1x1x128xf32>,
      %cst_61 = arith.constant 0.000000e+00 : f32
      %94 = vector.broadcast %cst_61 : f32 to vector<1x1x128xf32>
      %c0_62 = arith.constant 0 : index
      %c0_63 = arith.constant 0 : index
      %c0_64 = arith.constant 0 : index
      %95 = vector.load %arg12[%c0_62, %c0_63, %c0_64] : memref<1x1x128xf32, #tpu.memory_space<vmem>>, vector<1x1x128xf32>
      tpu.vector_store %arg12[%c0_62, %c0_63, %c0_64], %94 {strides = array<i32>} : memref<1x1x128xf32, #tpu.memory_space<vmem>>, vector<1x1x128xf32>,
      %cst_65 = arith.constant 0.000000e+00 : f32
      %96 = vector.broadcast %cst_65 : f32 to vector<1x1x128xf32>
      %c0_66 = arith.constant 0 : index
      %c0_67 = arith.constant 0 : index
      %c0_68 = arith.constant 0 : index
      %97 = vector.load %arg13[%c0_66, %c0_67, %c0_68] : memref<1x1x128xf32, #tpu.memory_space<vmem>>, vector<1x1x128xf32>
      tpu.vector_store %arg13[%c0_66, %c0_67, %c0_68], %96 {strides = array<i32>} : memref<1x1x128xf32, #tpu.memory_space<vmem>>, vector<1x1x128xf32>,
    } else {
    }
    %c0 = arith.constant 0 : index
    %c0_1 = arith.constant 0 : index
    %c0_2 = arith.constant 0 : index
    %3 = vector.load %arg2[%c0, %c0_1, %c0_2] : memref<1x16x33xf32, #tpu.memory_space<vmem>>, vector<1x16x33xf32>
    %c0_3 = arith.constant 0 : index
    %c0_4 = arith.constant 0 : index
    %c0_5 = arith.constant 0 : index
    %4 = vector.load %arg3[%c0_3, %c0_4, %c0_5] : memref<1x16x33xf32, #tpu.memory_space<vmem>>, vector<1x16x33xf32>
    %c0_6 = arith.constant 0 : index
    %c0_7 = arith.constant 0 : index
    %c0_8 = arith.constant 0 : index
    %5 = vector.load %arg4[%c0_6, %c0_7, %c0_8] : memref<1x16x33xf32, #tpu.memory_space<vmem>>, vector<1x16x33xf32>
    %c0_9 = arith.constant 0 : index
    %c0_10 = arith.constant 0 : index
    %c0_11 = arith.constant 0 : index
    %6 = vector.load %arg5[%c0_9, %c0_10, %c0_11] : memref<1x16x33xf32, #tpu.memory_space<vmem>>, vector<1x16x33xf32>
    %c0_12 = arith.constant 0 : index
    %c0_13 = arith.constant 0 : index
    %c0_14 = arith.constant 0 : index
    %7 = vector.load %arg6[%c0_12, %c0_13, %c0_14] : memref<1x16x33xf32, #tpu.memory_space<vmem>>, vector<1x16x33xf32>
    %c0_15 = arith.constant 0 : index
    %c0_16 = arith.constant 0 : index
    %c0_17 = arith.constant 0 : index
    %8 = vector.load %arg7[%c0_15, %c0_16, %c0_17] : memref<1x16x33xf32, #tpu.memory_space<vmem>>, vector<1x16x33xf32>
    %c0_18 = arith.constant 0 : index
    %c0_19 = arith.constant 0 : index
    %c0_20 = arith.constant 0 : index
    %9 = vector.load %arg8[%c0_18, %c0_19, %c0_20] : memref<1x16x33xf32, #tpu.memory_space<vmem>>, vector<1x16x33xf32>
    %c0_21 = arith.constant 0 : index
    %c0_22 = arith.constant 0 : index
    %c0_23 = arith.constant 0 : index
    %10 = vector.load %arg9[%c0_21, %c0_22, %c0_23] : memref<1x16x33xf32, #tpu.memory_space<vmem>>, vector<1x16x33xf32>
    %c0_24 = arith.constant 0 : index
    %c0_25 = arith.constant 0 : index
    %c0_26 = arith.constant 0 : index
    %11 = vector.load %arg10[%c0_24, %c0_25, %c0_26] : memref<1x16x33xf32, #tpu.memory_space<vmem>>, vector<1x16x33xf32>
    %12 = arith.mulf %3, %3 : vector<1x16x33xf32>
    %13 = arith.mulf %4, %4 : vector<1x16x33xf32>
    %14 = arith.addf %12, %13 : vector<1x16x33xf32>
    %cst = arith.constant 9.99999996E-13 : f32
    %15 = vector.broadcast %cst : f32 to vector<1x16x33xf32>
    %16 = arith.addf %14, %15 : vector<1x16x33xf32>
    %17 = arith.mulf %5, %5 : vector<1x16x33xf32>
    %18 = arith.mulf %6, %6 : vector<1x16x33xf32>
    %19 = arith.addf %17, %18 : vector<1x16x33xf32>
    %cst_27 = arith.constant 9.99999996E-13 : f32
    %20 = vector.broadcast %cst_27 : f32 to vector<1x16x33xf32>
    %21 = arith.addf %19, %20 : vector<1x16x33xf32>
    %22 = arith.mulf %7, %7 : vector<1x16x33xf32>
    %23 = arith.mulf %8, %8 : vector<1x16x33xf32>
    %24 = arith.addf %22, %23 : vector<1x16x33xf32>
    %cst_28 = arith.constant 9.99999996E-13 : f32
    %25 = vector.broadcast %cst_28 : f32 to vector<1x16x33xf32>
    %26 = arith.addf %24, %25 : vector<1x16x33xf32>
    %27 = arith.mulf %9, %9 : vector<1x16x33xf32>
    %28 = arith.mulf %10, %10 : vector<1x16x33xf32>
    %29 = arith.addf %27, %28 : vector<1x16x33xf32>
    %cst_29 = arith.constant 9.99999996E-13 : f32
    %30 = vector.broadcast %cst_29 : f32 to vector<1x16x33xf32>
    %31 = arith.addf %29, %30 : vector<1x16x33xf32>
    %32 = arith.divf %16, %21 : vector<1x16x33xf32>
    %33 = math.log %32 : vector<1x16x33xf32>
    %cst_30 = arith.constant 4.34294462 : f32
    %34 = vector.broadcast %cst_30 : f32 to vector<1x16x33xf32>
    %35 = arith.mulf %34, %33 : vector<1x16x33xf32>
    %36 = arith.divf %26, %31 : vector<1x16x33xf32>
    %37 = math.log %36 : vector<1x16x33xf32>
    %cst_31 = arith.constant 4.34294462 : f32
    %38 = vector.broadcast %cst_31 : f32 to vector<1x16x33xf32>
    %39 = arith.mulf %38, %37 : vector<1x16x33xf32>
    %40 = arith.subf %35, %39 : vector<1x16x33xf32>
    %41 = math.absf %40 : vector<1x16x33xf32>
    %cst_32 = arith.constant 9.99999997E-7 : f32
    %42 = vector.broadcast %cst_32 : f32 to vector<1x16x33xf32>
    %43 = arith.addf %3, %42 : vector<1x16x33xf32>
    %cst_33 = arith.constant 9.99999997E-7 : f32
    %44 = vector.broadcast %cst_33 : f32 to vector<1x16x33xf32>
    %45 = arith.addf %5, %44 : vector<1x16x33xf32>
    %cst_34 = arith.constant 9.99999997E-7 : f32
    %46 = vector.broadcast %cst_34 : f32 to vector<1x16x33xf32>
    %47 = arith.addf %7, %46 : vector<1x16x33xf32>
    %cst_35 = arith.constant 9.99999997E-7 : f32
    %48 = vector.broadcast %cst_35 : f32 to vector<1x16x33xf32>
    %49 = arith.addf %9, %48 : vector<1x16x33xf32>
    %50 = arith.mulf %4, %45 : vector<1x16x33xf32>
    %51 = arith.mulf %43, %6 : vector<1x16x33xf32>
    %52 = arith.subf %50, %51 : vector<1x16x33xf32>
    %53 = arith.mulf %43, %45 : vector<1x16x33xf32>
    %54 = arith.mulf %4, %6 : vector<1x16x33xf32>
    %55 = arith.addf %53, %54 : vector<1x16x33xf32>
    %56 = math.atan2 %52, %55 : vector<1x16x33xf32>
    %57 = arith.mulf %8, %49 : vector<1x16x33xf32>
    %58 = arith.mulf %47, %10 : vector<1x16x33xf32>
    %59 = arith.subf %57, %58 : vector<1x16x33xf32>
    %60 = arith.mulf %47, %49 : vector<1x16x33xf32>
    %61 = arith.mulf %8, %10 : vector<1x16x33xf32>
    %62 = arith.addf %60, %61 : vector<1x16x33xf32>
    %63 = math.atan2 %59, %62 : vector<1x16x33xf32>
    %64 = arith.subf %56, %63 : vector<1x16x33xf32>
    %65 = math.absf %64 : vector<1x16x33xf32>
    %c0_36 = arith.constant 0 : index
    %c0_37 = arith.constant 0 : index
    %c0_38 = arith.constant 0 : index
    %66 = vector.load %arg11[%c0_36, %c0_37, %c0_38] : memref<1x1x128xf32, #tpu.memory_space<vmem>>, vector<1x1x128xf32>
    %67 = arith.mulf %41, %11 : vector<1x16x33xf32>
    %68 = vector.shape_cast %67 : vector<1x16x33xf32> to vector<1x1x16x33xf32>
    %cst_39 = arith.constant dense<0.000000e+00> : vector<1xf32>
    %69 = vector.multi_reduction <add>, %68, %cst_39 [1, 2, 3] : vector<1x1x16x33xf32> to vector<1xf32>
    %70 = vector.shape_cast %69 : vector<1xf32> to vector<1x1x1x1xf32>
    %71 = vector.extract %70[0, 0, 0, 0] : f32 from vector<1x1x1x1xf32>
    %72 = vector.broadcast %71 : f32 to vector<1x1x128xf32>
    %73 = arith.addf %66, %72 : vector<1x1x128xf32>
    %c0_40 = arith.constant 0 : index
    %c0_41 = arith.constant 0 : index
    %c0_42 = arith.constant 0 : index
    %74 = vector.load %arg11[%c0_40, %c0_41, %c0_42] : memref<1x1x128xf32, #tpu.memory_space<vmem>>, vector<1x1x128xf32>
    tpu.vector_store %arg11[%c0_40, %c0_41, %c0_42], %73 {strides = array<i32>} : memref<1x1x128xf32, #tpu.memory_space<vmem>>, vector<1x1x128xf32>,
    %c0_43 = arith.constant 0 : index
    %c0_44 = arith.constant 0 : index
    %c0_45 = arith.constant 0 : index
    %75 = vector.load %arg12[%c0_43, %c0_44, %c0_45] : memref<1x1x128xf32, #tpu.memory_space<vmem>>, vector<1x1x128xf32>
    %76 = arith.mulf %65, %11 : vector<1x16x33xf32>
    %77 = vector.shape_cast %76 : vector<1x16x33xf32> to vector<1x1x16x33xf32>
    %cst_46 = arith.constant dense<0.000000e+00> : vector<1xf32>
    %78 = vector.multi_reduction <add>, %77, %cst_46 [1, 2, 3] : vector<1x1x16x33xf32> to vector<1xf32>
    %79 = vector.shape_cast %78 : vector<1xf32> to vector<1x1x1x1xf32>
    %80 = vector.extract %79[0, 0, 0, 0] : f32 from vector<1x1x1x1xf32>
    %81 = vector.broadcast %80 : f32 to vector<1x1x128xf32>
    %82 = arith.addf %75, %81 : vector<1x1x128xf32>
    %c0_47 = arith.constant 0 : index
    %c0_48 = arith.constant 0 : index
    %c0_49 = arith.constant 0 : index
    %83 = vector.load %arg12[%c0_47, %c0_48, %c0_49] : memref<1x1x128xf32, #tpu.memory_space<vmem>>, vector<1x1x128xf32>
    tpu.vector_store %arg12[%c0_47, %c0_48, %c0_49], %82 {strides = array<i32>} : memref<1x1x128xf32, #tpu.memory_space<vmem>>, vector<1x1x128xf32>,
    %c0_50 = arith.constant 0 : index
    %c0_51 = arith.constant 0 : index
    %c0_52 = arith.constant 0 : index
    %84 = vector.load %arg13[%c0_50, %c0_51, %c0_52] : memref<1x1x128xf32, #tpu.memory_space<vmem>>, vector<1x1x128xf32>
    %85 = vector.shape_cast %11 : vector<1x16x33xf32> to vector<1x1x16x33xf32>
    %cst_53 = arith.constant dense<0.000000e+00> : vector<1xf32>
    %86 = vector.multi_reduction <add>, %85, %cst_53 [1, 2, 3] : vector<1x1x16x33xf32> to vector<1xf32>
    %87 = vector.shape_cast %86 : vector<1xf32> to vector<1x1x1x1xf32>
    %88 = vector.extract %87[0, 0, 0, 0] : f32 from vector<1x1x1x1xf32>
    %89 = vector.broadcast %88 : f32 to vector<1x1x128xf32>
    %90 = arith.addf %84, %89 : vector<1x1x128xf32>
    %c0_54 = arith.constant 0 : index
    %c0_55 = arith.constant 0 : index
    %c0_56 = arith.constant 0 : index
    %91 = vector.load %arg13[%c0_54, %c0_55, %c0_56] : memref<1x1x128xf32, #tpu.memory_space<vmem>>, vector<1x1x128xf32>
    tpu.vector_store %arg13[%c0_54, %c0_55, %c0_56], %90 {strides = array<i32>} : memref<1x1x128xf32, #tpu.memory_space<vmem>>, vector<1x1x128xf32>,
    return
  }
  func.func @transform_0(%arg0: i32, %arg1: i32) -> (i32, i32, i32) {
    %c0_i32 = arith.constant 0 : i32
    %c0_i32_0 = arith.constant 0 : i32
    return %arg0, %arg1, %c0_i32 : i32, i32, i32
  }
  func.func @transform_1(%arg0: i32, %arg1: i32) -> (i32, i32, i32) {
    %c0_i32 = arith.constant 0 : i32
    %c0_i32_0 = arith.constant 0 : i32
    return %arg0, %arg1, %c0_i32 : i32, i32, i32
  }
  func.func @transform_2(%arg0: i32, %arg1: i32) -> (i32, i32, i32) {
    %c0_i32 = arith.constant 0 : i32
    %c0_i32_0 = arith.constant 0 : i32
    return %arg0, %arg1, %c0_i32 : i32, i32, i32
  }
  func.func @transform_3(%arg0: i32, %arg1: i32) -> (i32, i32, i32) {
    %c0_i32 = arith.constant 0 : i32
    %c0_i32_0 = arith.constant 0 : i32
    return %arg0, %arg1, %c0_i32 : i32, i32, i32
  }
  func.func @transform_4(%arg0: i32, %arg1: i32) -> (i32, i32, i32) {
    %c0_i32 = arith.constant 0 : i32
    %c0_i32_0 = arith.constant 0 : i32
    return %arg0, %arg1, %c0_i32 : i32, i32, i32
  }
  func.func @transform_5(%arg0: i32, %arg1: i32) -> (i32, i32, i32) {
    %c0_i32 = arith.constant 0 : i32
    %c0_i32_0 = arith.constant 0 : i32
    return %arg0, %arg1, %c0_i32 : i32, i32, i32
  }
  func.func @transform_6(%arg0: i32, %arg1: i32) -> (i32, i32, i32) {
    %c0_i32 = arith.constant 0 : i32
    %c0_i32_0 = arith.constant 0 : i32
    return %arg0, %arg1, %c0_i32 : i32, i32, i32
  }
  func.func @transform_7(%arg0: i32, %arg1: i32) -> (i32, i32, i32) {
    %c0_i32 = arith.constant 0 : i32
    %c0_i32_0 = arith.constant 0 : i32
    return %arg0, %arg1, %c0_i32 : i32, i32, i32
  }
  func.func @transform_8(%arg0: i32, %arg1: i32) -> (i32, i32, i32) {
    %c0_i32 = arith.constant 0 : i32
    %c0_i32_0 = arith.constant 0 : i32
    return %arg0, %arg1, %c0_i32 : i32, i32, i32
  }
  func.func @transform_9(%arg0: i32, %arg1: i32) -> (i32, i32, i32) {
    %c0_i32 = arith.constant 0 : i32
    %c0_i32_0 = arith.constant 0 : i32
    %c0_i32_1 = arith.constant 0 : i32
    return %arg0, %c0_i32, %c0_i32_0 : i32, i32, i32
  }
  func.func @transform_10(%arg0: i32, %arg1: i32) -> (i32, i32, i32) {
    %c0_i32 = arith.constant 0 : i32
    %c0_i32_0 = arith.constant 0 : i32
    %c0_i32_1 = arith.constant 0 : i32
    return %arg0, %c0_i32, %c0_i32_0 : i32, i32, i32
  }
  func.func @transform_11(%arg0: i32, %arg1: i32) -> (i32, i32, i32) {
    %c0_i32 = arith.constant 0 : i32
    %c0_i32_0 = arith.constant 0 : i32
    %c0_i32_1 = arith.constant 0 : i32
    return %arg0, %c0_i32, %c0_i32_0 : i32, i32, i32
  }
}

</mosaic_0001>

<bundles_post_ra>
// kernel: binaural_loss.2
= control target key start
LH: loop header
LB: loop body
LE: loop exit
PB: predicated region body
PF: predicated region fallthrough
CT: control target
= control target key end

     0   :  { %s504_s9 = smov 0   ;;  %s563_s0 = inlined_call_operand.vmem [shape: bf16[256,64], index: 0, kind: input, shape index: {}]   ;;  %s564_s1 = inlined_call_operand.vmem [shape: bf16[64,128], index: 1, kind: input, shape index: {}]   ;;  %s565_s2 = inlined_call_operand.vmem [shape: f32[256,128], index: 2, kind: output, shape index: {}]  }
   0x1 LB: > { %s382_s10 = sadd.s32 4294967295, %s487_s9   ;;  %p386_p0 = scmp.ge.s32.totalorder %s487_s9, 1  ;;  %s487_s9 = sphi %s504_s9, %s12_s9  }
   0x2   : > { %p113_p1 = scmp.lt.s32.totalorder %s487_s9, 3 }
   0x4   : > { %p114_p2 = pnand %p386_p0, %p113_p1 }
   0x5   : > { %s387_s13 = sshll.u32 (!%p114_p2), %s382_s10, 4 }
   0x6   : > { %117 = sbr.rel (%p114_p2) target bundleno = 186 (0xba), region = 28  ;;  %p136_p3 = scmp.lt.s32.totalorder (!%p114_p2), %s387_s13, 31 }
   0xb   : > { %v460_v0 = vld [vmem:[%s564_s1 + $0x18] sm:$0xff]  ;;  %v459_v1 = vld [vmem:[%s564_s1 + $0x10] sm:$0xff]  ;;  %s567_s13 = smov (!%p136_p3, %s387_s13), 31  ;;  %v458_v2 = vld [vmem:[%s564_s1 + $0x8] sm:$0xff]  ;;  %vm236_vm0 = vcmask 523264  }
   0xc   : > { %265 = vmatpush.bf16.msra.mxu0 %v460_v0  ;;  %461 = vmatpush.bf16.msra.mxu1 %v460_v0  ;;  %s388_s18 = sshll.u32 %s567_s13, 2  ;;  %v457_v3 = vld [vmem:[%s564_s1] sm:$0xff]  ;;  %s390_s24 = sshll.u32 %s567_s13, 3 }
   0xd   : > { %462 = vmatpush.bf16.msra.mxu2 %v460_v0  ;;  %463 = vmatpush.bf16.msra.mxu3 %v460_v0  ;;  %s139_s23 = scalar_lea.vmem %s563_s0, %s388_s18  ;;  %s542_s27 = scalar_lea.vmem %s565_s2, %s390_s24 }
   0xe   : > { %v449_v4 = vld [vmem:[%s139_s23] sm:$0xff]  ;;  %v451_v5 = vld [vmem:[%s139_s23 + $0x10] sm:$0xff]  ;;  %v450_v8 = vld [vmem:[%s139_s23 + $0x8] sm:$0xff] }
   0xf   : > { %v453_v6 = vld [vmem:[%s139_s23 + $0x20] sm:$0xff]  ;;  %v455_v7 = vld [vmem:[%s139_s23 + $0x30] sm:$0xff]  ;;  %v452_v9 = vld [vmem:[%s139_s23 + $0x18] sm:$0xff] }
  0x10   : > { %266 = vmatpush.bf16.msra.mxu0 %v459_v1  ;;  %464 = vmatpush.bf16.msra.mxu1 %v459_v1  ;;  %v454_v10 = vld [vmem:[%s139_s23 + $0x28] sm:$0xff]  ;;  %v456_v11 = vld [vmem:[%s139_s23 + $0x38] sm:$0xff] }
  0x11   : > { %465 = vmatpush.bf16.msra.mxu2 %v459_v1  ;;  %466 = vmatpush.bf16.msra.mxu3 %v459_v1 }
  0x14   : > { %267 = vmatpush.bf16.msra.mxu0 %v458_v2  ;;  %467 = vmatpush.bf16.msra.mxu1 %v458_v2 }
  0x15   : > { %468 = vmatpush.bf16.msra.mxu2 %v458_v2  ;;  %469 = vmatpush.bf16.msra.mxu3 %v458_v2 }
  0x18   : > { %268 = vmatpush.bf16.msra.mxu0 %v457_v3  ;;  %470 = vmatpush.bf16.msra.mxu1 %v457_v3 }
  0x19   : > { %471 = vmatpush.bf16.msra.mxu2 %v457_v3  ;;  %472 = vmatpush.bf16.msra.mxu3 %v457_v3 }
  0x1b   : > { %439 = vmatmul.msk.bf16.vlgmr.msra.gmra.mxu0 %vm236_vm0, %v449_v4  ;;  %441 = vmatmul.msk.bf16.vlgmr.msra.gmra.mxu1 %vm236_vm0, %v451_v5 }
  0x1c   : > { %443 = vmatmul.msk.bf16.vlgmr.msra.gmra.mxu2 %vm236_vm0, %v453_v6  ;;  %445 = vmatmul.msk.bf16.vlgmr.msra.gmra.mxu3 %vm236_vm0, %v455_v7 }
  0x2b   : > { %440 = vmatmul.msk.bf16.gmra.mxu0 %vm236_vm0, %v450_v8  ;;  %442 = vmatmul.msk.bf16.gmra.mxu1 %vm236_vm0, %v452_v9 }
  0x2c   : > { %444 = vmatmul.msk.bf16.gmra.mxu2 %vm236_vm0, %v454_v10  ;;  %446 = vmatmul.msk.bf16.gmra.mxu3 %vm236_vm0, %v456_v11 }
  0x98   : > { %v270_v12 = vpop.f32.mrf.mxu0  ;;  %v280_v13 = vpop.f32.mrf.mxu1 }
  0x99   : > { %310 = vst [vmem:[%s542_s27] sm:$0xff] %v270_v12 }
  0x9a   : > { %314 = vst [vmem:[%s542_s27 + $0x20] sm:$0xff] %v280_v13 }
  0x9f   : > { %v290_v14 = vpop.f32.mrf.mxu2  ;;  %v300_v15 = vpop.f32.mrf.mxu3 }
  0xa0   : > { %318 = vst [vmem:[%s542_s27 + $0x40] sm:$0xff] %v290_v14  ;;  %v272_v16 = vpop.f32.mrf.mxu0  ;;  %v282_v17 = vpop.f32.mrf.mxu1 }
  0xa1   : > { %322 = vst [vmem:[%s542_s27 + $0x60] sm:$0xff] %v300_v15 }
  0xa2   : > { %311 = vst [vmem:[%s542_s27 + $0x8] sm:$0xff] %v272_v16 }
  0xa3   : > { %315 = vst [vmem:[%s542_s27 + $0x28] sm:$0xff] %v282_v17 }
  0xa7   : > { %v292_v18 = vpop.f32.mrf.mxu2  ;;  %v302_v19 = vpop.f32.mrf.mxu3 }
  0xa8   : > { %319 = vst [vmem:[%s542_s27 + $0x48] sm:$0xff] %v292_v18  ;;  %v275_v20 = vpop.f32.mrf.mxu0  ;;  %v285_v21 = vpop.f32.mrf.mxu1 }
  0xa9   : > { %323 = vst [vmem:[%s542_s27 + $0x68] sm:$0xff] %v302_v19 }
  0xaa   : > { %312 = vst [vmem:[%s542_s27 + $0x10] sm:$0xff] %v275_v20 }
  0xab   : > { %316 = vst [vmem:[%s542_s27 + $0x30] sm:$0xff] %v285_v21 }
  0xaf   : > { %v295_v22 = vpop.f32.mrf.mxu2  ;;  %v305_v23 = vpop.f32.mrf.mxu3 }
  0xb0   : > { %320 = vst [vmem:[%s542_s27 + $0x50] sm:$0xff] %v295_v22  ;;  %v277_v24 = vpop.f32.mrf.mxu0  ;;  %v287_v25 = vpop.f32.mrf.mxu1 }
  0xb1   : > { %324 = vst [vmem:[%s542_s27 + $0x70] sm:$0xff] %v305_v23 }
  0xb2   : > { %313 = vst [vmem:[%s542_s27 + $0x18] sm:$0xff] %v277_v24 }
  0xb3   : > { %317 = vst [vmem:[%s542_s27 + $0x38] sm:$0xff] %v287_v25 }
  0xb7   : > { %v297_v26 = vpop.f32.mrf.mxu2  ;;  %v307_v27 = vpop.f32.mrf.mxu3 }
  0xb8   : > { %321 = vst [vmem:[%s542_s27 + $0x58] sm:$0xff] %v297_v26 }
  0xb9   : > { %325 = vst [vmem:[%s542_s27 + $0x78] sm:$0xff] %v307_v27 }
  0xba PF: > { %s12_s9 = sadd.s32 1, %s487_s9  }
  0xbb   : > { %p9_p4 = scmp.ge.s32.totalorder %s12_s9, 4  }
  0xbd   :  { %11 = sbr.rel (!%p9_p4) target bundleno = 1 (0x1), region = 58 }

// kernel: binaural_loss.3
= control target key start
LH: loop header
LB: loop body
LE: loop exit
PB: predicated region body
PF: predicated region fallthrough
CT: control target
= control target key end

     0   :  { %s1647_s17 = smov 0   ;;  %s1649_s18 = smov 0   ;;  %s2218_s0 = inlined_call_operand.vmem [shape: f32[2,32,33], index: 0, kind: input, shape index: {}]   ;;  %s2219_s1 = inlined_call_operand.vmem [shape: f32[2,32,33], index: 1, kind: input, shape index: {}]   ;;  %s2220_s2 = inlined_call_operand.vmem [shape: f32[2,32,33], index: 2, kind: input, shape index: {}]   ;;  %s2221_s3 = inlined_call_operand.vmem [shape: f32[2,32,33], index: 3, kind: input, shape index: {}]   ;;  %s2222_s4 = inlined_call_operand.vmem [shape: f32[2,32,33], index: 4, kind: input, shape index: {}]   ;;  %s2223_s5 = inlined_call_operand.vmem [shape: f32[2,32,33], index: 5, kind: input, shape index: {}]   ;;  %s2224_s6 = inlined_call_operand.vmem [shape: f32[2,32,33], index: 6, kind: input, shape index: {}]   ;;  %s2225_s7 = inlined_call_operand.vmem [shape: f32[2,32,33], index: 7, kind: input, shape index: {}]   ;;  %s2226_s8 = inlined_call_operand.vmem [shape: f32[2,32,33], index: 8, kind: input, shape index: {}]   ;;  %s2227_s9 = inlined_call_operand.vmem [shape: f32[2,1,128], index: 9, kind: output, shape index: {0}]   ;;  %s2228_s10 = inlined_call_operand.vmem [shape: f32[2,1,128], index: 10, kind: output, shape index: {1}]   ;;  %s2229_s11 = inlined_call_operand.vmem [shape: f32[2,1,128], index: 11, kind: output, shape index: {2}]  }
   0x1   :  { %2234 = sst [smem:[#allocation7_spill]] %s2218_s0  ;;  %s1651_s19 = smov 0  }
   0x2   :  { %2235 = sst [smem:[#allocation8_spill]] %s2219_s1  ;;  %s1653_s20 = smov 0  }
   0x3   :  { %2236 = sst [smem:[#allocation9_spill]] %s2227_s9  ;;  %s1655_s21 = smov 0  }
   0x4   :  { %2237 = sst [smem:[#allocation10_spill]] %s2228_s10 }
   0x5   :  { %2238 = sst [smem:[#allocation11_spill]] %s2229_s11 }
   0x6 LB: > { %2239 = sst [smem:[#allocation2_spill]] %s1574_s19  ;;  %s31_s22 = sadd.s32 1, %s1574_s19  ;;  %s1582_s21 = sphi %s1655_s21, %s22_s21   ;;  %s1578_s20 = sphi %s1653_s20, %s2297_s20   ;;  %s1574_s19 = sphi %s1651_s19, %s2296_s19   ;;  %s1570_s18 = sphi %s1649_s18, %s2295_s18   ;;  %s1566_s17 = sphi %s1647_s17, %s2294_s17  }
   0x7   : > { %2240 = sst [smem:[#allocation3_spill]] %s1578_s20  ;;  %s34_s23 = sadd.s32 1, %s1578_s20 }
   0x8   : > { %2241 = sst [smem:[#allocation4_spill]] %s1582_s21  ;;  %p32_p0 = scmp.ge.s32.totalorder %s31_s22, 2 }
   0x9   : > { %p1440_p1 = scmp.ge.s32.totalorder %s1582_s21, 1  ;;  %p497_p2 = scmp.lt.s32.totalorder %s1582_s21, 5 }
   0xa   : > { %s2299_s22 = smov (%p32_p0, %s31_s22), 0  ;;  %s2301_s23 = smov (!%p32_p0, %s34_s23), %s1578_s20 }
   0xb   : > { %2242 = sst [smem:[#allocation5_spill]] %s2299_s22  ;;  %p498_p3 = pnand %p1440_p1, %p497_p2 }
   0xc   : > { %p36_p4 = scmp.ge.s32.totalorder %s2301_s23, 2  ;;  %s1441_s24 = sshll.u32 (!%p498_p3), %s1566_s17, 1 }
   0xd   : > { %501 = sbr.rel (%p498_p3) target bundleno = 347 (0x15b), region = 56  ;;  %p618_p5 = scmp.lt.s32.totalorder (!%p498_p3), %s1570_s18, 1 }
   0xe   : > { %s2303_s23 = smov (%p36_p4, %s2301_s23), 0  ;;  %p620_p6 = scmp.lt.s32.totalorder (!%p498_p3), %s1441_s24, 3 }
   0xf   : > { %2243 = sst [smem:[#allocation6_spill]] %s2303_s23  ;;  %p1468_p7 = scmp.ne.s32.totalorder (!%p498_p3), %s1566_s17, 0 }
  0x10   : > { %s2244_s9 = sld [smem:[#allocation9_spill]] (!%p498_p3) }
  0x11   : > { %s2245_s10 = sld [smem:[#allocation10_spill]] (!%p498_p3) }
  0x12   : > { %s2305_s18 = smov (!%p618_p5, %s1570_s18), 1  ;;  %s2307_s24 = smov (!%p620_p6, %s1441_s24), 3 }
  0x13   : > { %s1442_s25 = sshll.u32 %s2305_s18, 2  ;;  %s2246_s11 = sld [smem:[#allocation11_spill]] }
  0x14   : > { %s623_s29 = sadd.s32 %s1442_s25, %s2307_s24  ;;  %s2247_s0 = sld [smem:[#allocation7_spill]] }
  0x15   : > { %s1443_s14 = sshll.u32 %s623_s29, 3  ;;  %s2248_s1 = sld [smem:[#allocation8_spill]] }
  0x16   : > { %s1683_s28 = scalar_lea.vmem %s2244_s9, %s2305_s18  ;;  %s645_s30 = scalar_lea.vmem %s2220_s2, %s1443_s14 }
  0x17   : > { %s1688_s13 = scalar_lea.vmem %s2245_s10, %s2305_s18  ;;  %s655_s29 = scalar_lea.vmem %s2221_s3, %s1443_s14 }
  0x18   : > { %s675_s20 = scalar_lea.vmem %s2223_s5, %s1443_s14  ;;  %s1716_s21 = scalar_lea.vmem %s2224_s6, %s1443_s14 }
  0x19   : > { %s1693_s23 = scalar_lea.vmem %s2246_s11, %s2305_s18  ;;  %s665_s18 = scalar_lea.vmem %s2222_s4, %s1443_s14 }
  0x1a   : > { %s625_s19 = scalar_lea.vmem %s2247_s0, %s1443_s14  ;;  %s1721_s25 = scalar_lea.vmem %s2225_s7, %s1443_s14 }
  0x1b   : > { %s635_s27 = scalar_lea.vmem %s2248_s1, %s1443_s14  ;;  %s1726_s1 = scalar_lea.vmem %s2226_s8, %s1443_s14 }
  0x1c   : > { %719 = sbr.rel (%p1468_p7) target bundleno = 37 (0x25), region = 60 }
  0x21   : > { %v1584_v0 = vmov 0.0  }
  0x22   : > { %720 = vst [vmem:[%s1683_s28] sm:$0x1] %v1584_v0 }
  0x23   : > { %721 = vst [vmem:[%s1688_s13] sm:$0x1] %v1584_v0 }
  0x24   : > { %722 = vst [vmem:[%s1693_s23] sm:$0x1] %v1584_v0 }
  0x25 PF: > { %v723_v1 = vld [vmem:[%s625_s19] sm:$0xff]  ;;  %v724_v2 = vld [vmem:[%s625_s19 + $0x8] sm:$0xff] }
  0x26   : > { %v1732_v3 = vld [vmem:[%s635_s27] sm:$0xff]  ;;  %v1734_v4 = vld [vmem:[%s635_s27 + $0x8] sm:$0xff]  ;;  %v741_v7 = vmul.f32 %v723_v1, %v723_v1  ;;  %v742_v8 = vmul.f32 %v724_v2, %v724_v2  ;;  %v849_v36 = vadd.f32 1e-06, %v723_v1  ;;  %v850_v44 = vadd.f32 1e-06, %v724_v2 }
  0x27   : > { %v727_v5 = vld [vmem:[%s645_s30] sm:$0xff]  ;;  %v728_v6 = vld [vmem:[%s645_s30 + $0x8] sm:$0xff]  ;;  %v743_v9 = vmul.f32 %v1732_v3, %v1732_v3  ;;  %v744_v13 = vmul.f32 %v1734_v4, %v1734_v4 }
  0x28   : > { %v1738_v10 = vld [vmem:[%s655_s29] sm:$0xff]  ;;  %v1740_v11 = vld [vmem:[%s655_s29 + $0x8] sm:$0xff]  ;;  %v749_v14 = vmul.f32 %v727_v5, %v727_v5  ;;  %v750_v15 = vmul.f32 %v728_v6, %v728_v6  ;;  %v851_v47 = vadd.f32 1e-06, %v727_v5  ;;  %v852_v62 = vadd.f32 1e-06, %v728_v6 }
  0x29   : > { %v1742_v12 = vld [vmem:[%s665_s18] sm:$0xff]  ;;  %v1746_v16 = vld [vmem:[%s665_s18 + $0x8] sm:$0xff]  ;;  %v745_v19 = vadd.f32 %v743_v9, %v741_v7  ;;  %v751_v20 = vmul.f32 %v1738_v10, %v1738_v10  ;;  %v752_v21 = vmul.f32 %v1740_v11, %v1740_v11  ;;  %v746_v24 = vadd.f32 %v744_v13, %v742_v8 }
  0x2a   : > { %v1748_v17 = vld [vmem:[%s675_s20] sm:$0xff]  ;;  %v1750_v18 = vld [vmem:[%s675_s20 + $0x8] sm:$0xff]  ;;  %v757_v22 = vmul.f32 %v1742_v12, %v1742_v12  ;;  %v758_v25 = vmul.f32 %v1746_v16, %v1746_v16  ;;  %v1804_v56 = vmul.f32 %v849_v36, %v1738_v10  ;;  %v1809_v58 = vmul.f32 %v851_v47, %v1732_v3 }
  0x2b   : > { %v1759_v23 = vld [vmem:[%s1716_s21] sm:$0xff]  ;;  %v759_v26 = vmul.f32 %v1748_v17, %v1748_v17  ;;  %v760_v27 = vmul.f32 %v1750_v18, %v1750_v18  ;;  %v736_v28 = vld [vmem:[%s1716_s21 + $0x8] sm:$0xff]  ;;  %v753_v29 = vadd.f32 %v751_v20, %v749_v14  ;;  %v754_v30 = vadd.f32 %v752_v21, %v750_v15 }
  0x2c   : > { %v765_v31 = vmul.f32 %v1759_v23, %v1759_v23  ;;  %v1771_v32 = vld [vmem:[%s1721_s25] sm:$0xff]  ;;  %v1774_v33 = vld [vmem:[%s1721_s25 + $0x8] sm:$0xff]  ;;  %v766_v35 = vmul.f32 %v736_v28, %v736_v28  ;;  %v1784_v41 = vadd.f32 1e-12, %v745_v19  ;;  %v1786_v42 = vadd.f32 1e-12, %v746_v24 }
  0x2d   : > { %v761_v34 = vadd.f32 %v759_v26, %v757_v22  ;;  %v1776_v37 = vadd.f32 1e-12, %v753_v29  ;;  %v1778_v38 = vadd.f32 1e-12, %v754_v30  ;;  %v767_v39 = vmul.f32 %v1771_v32, %v1771_v32 }
  0x2e   : > { %v768_v40 = vmul.f32 %v1774_v33, %v1774_v33  ;;  %v762_v43 = vadd.f32 %v760_v27, %v758_v25  ;;  %v853_v6 = vadd.f32 1e-06, %v1742_v12  ;;  %v854_v14 = vadd.f32 1e-06, %v1746_v16 }
  0x2f   : > { %v769_v45 = vadd.f32 %v767_v39, %v765_v31  ;;  %1520 = vrcp.f32 %v1776_v37  ;;  %v1789_v48 = vadd.f32 1e-12, %v761_v34  ;;  %v782_v49 = vand.u32 2147483647, %v1776_v37 }
  0x30   : > { %v770_v46 = vadd.f32 %v768_v40, %v766_v35  ;;  %v784_v50 = vand.u32 2147483648, %v1776_v37  ;;  %1522 = vrcp.f32 %v1778_v38  ;;  %v797_v53 = vand.u32 2147483647, %v1778_v38 }
  0x31   : > { %v1794_v51 = vadd.f32 1e-12, %v769_v45  ;;  %v1799_v54 = vadd.f32 1e-12, %v762_v43  ;;  %vm778_vm0 = vweird.f32 %v1776_v37  ;;  %v799_v55 = vand.u32 2147483648, %v1778_v38 }
  0x32   : > { %v1796_v52 = vadd.f32 1e-12, %v770_v46  ;;  %v785_v57 = vor.u32 1.1754944e-38, %v784_v50  ;;  %vm793_vm1 = vweird.f32 %v1778_v38  ;;  %vm1811_vm2 = vcmp.eq.f32.partialorder %v782_v49, 8.507059e+37 }
  0x33   : > { %1524 = vrcp.f32 %v1794_v51  ;;  %v818_v60 = vand.u32 2147483647, %v1794_v51  ;;  %v820_v61 = vand.u32 2147483648, %v1794_v51  ;;  %vm1818_vm3 = vcmp.eq.f32.partialorder %v797_v53, 8.507059e+37 }
  0x34   : > { %1526 = vrcp.f32 %v1796_v52  ;;  %v800_v1 = vor.u32 1.1754944e-38, %v799_v55  ;;  %vm814_vm4 = vweird.f32 %v1794_v51  ;;  %v833_v2 = vand.u32 2147483647, %v1796_v52 }
  0x35   : > { %v1521_v63 = vpop.eup %1520  ;;  %v835_v5 = vand.u32 2147483648, %v1796_v52  ;;  %vm829_vm6 = vweird.f32 %v1796_v52  ;;  %v821_v13 = vor.u32 1.1754944e-38, %v820_v61  ;;  %vm1830_vm8 = vcmp.eq.f32.partialorder %v818_v60, 8.507059e+37 }
  0x36   : > { %v1523_v7 = vpop.eup %1522  ;;  %v774_v8 = vmul.f32 %v1521_v63, %v1776_v37  ;;  %vm779_vm5 = vweird.f32 %v1521_v63  ;;  %v855_v21 = vadd.f32 1e-06, %v1759_v23  ;;  %v856_v22 = vadd.f32 1e-06, %v736_v28 }
  0x37   : > { %v789_v9 = vmul.f32 %v1523_v7, %v1778_v38  ;;  %vm794_vm7 = vweird.f32 %v1523_v7  ;;  %v836_v20 = vor.u32 1.1754944e-38, %v835_v5  ;;  %vm1835_vm9 = vcmp.eq.f32.partialorder %v833_v2, 8.507059e+37  ;;  %vm1847_vm10 = vmor %vm778_vm0, %vm779_vm5 }
  0x38   : > { %v775_v15 = vsub.f32 1.0, %v774_v8  ;;  %v858_v12 = vmul.f32 %v852_v62, %v1734_v4  ;;  %v863_v27 = vmul.f32 %v851_v47, %v849_v36  ;;  %v864_v29 = vmul.f32 %v852_v62, %v850_v44  ;;  %vm1857_vm12 = vmor %vm793_vm1, %vm794_vm7 }
  0x39   : > { %v1525_v24 = vpop.eup %1524  ;;  %v790_v25 = vsub.f32 1.0, %v789_v9  ;;  %v860_v34 = vmul.f32 %v850_v44, %v1740_v11  ;;  %v865_v23 = vmul.f32 %v1738_v10, %v1732_v3  ;;  %v866_v39 = vmul.f32 %v1740_v11, %v1734_v4 }
  0x3a   : > { %v1527_v16 = vpop.eup %1526  ;;  %v776_v30 = vmul.f32 %v1521_v63, %v775_v15  ;;  %v810_v31 = vmul.f32 %v1525_v24, %v1794_v51  ;;  %vm815_vm11 = vweird.f32 %v1525_v24  ;;  %v989_v46 = vmul.f32 %v855_v21, %v1748_v17 }
  0x3b   : > { %v791_v35 = vmul.f32 %v1523_v7, %v790_v25  ;;  %v825_v36 = vmul.f32 %v1527_v16, %v1796_v52  ;;  %vm830_vm13 = vweird.f32 %v1527_v16  ;;  %v1861_v37 = vadd.f32 %v865_v23, %v863_v27  ;;  %vm1877_vm14 = vmor %vm814_vm4, %vm815_vm11 }
  0x3c   : > { %v777_v40 = vadd.f32 %v1521_v63, %v776_v30  ;;  %v811_v10 = vsub.f32 1.0, %v810_v31  ;;  %v1863_v45 = vadd.f32 %v866_v39, %v864_v29  ;;  %v990_v38 = vmul.f32 %v856_v22, %v1750_v18  ;;  %vm1888_vm15 = vmor %vm829_vm6, %vm830_vm13 }
  0x3d   : > { %v792_v43 = vadd.f32 %v1523_v7, %v791_v35  ;;  %v826_v44 = vsub.f32 1.0, %v825_v36  ;;  %v991_v47 = vmul.f32 %v853_v6, %v1771_v32  ;;  %v992_v60 = vmul.f32 %v854_v14, %v1774_v33 }
  0x3e   : > { %v781_v4 = vsel %vm1847_vm10, %v1521_v63, %v777_v40  ;;  %v812_v11 = vmul.f32 %v1525_v24, %v811_v10  ;;  %v995_v62 = vmul.f32 %v855_v21, %v853_v6  ;;  %v996_v5 = vmul.f32 %v856_v22, %v854_v14 }
  0x3f   : > { %v786_v49 = vsel %vm1811_vm2, %v785_v57, %v781_v4  ;;  %v796_v50 = vsel %vm1857_vm12, %v1523_v7, %v792_v43  ;;  %v827_v55 = vmul.f32 %v1527_v16, %v826_v44  ;;  %v998_v52 = vmul.f32 %v1774_v33, %v1750_v18  ;;  %v1904_v7 = vld [vmem:[%s1726_s1] sm:$0xff] }
  0x40   : > { %v787_v61 = vmul.f32 %v786_v49, %v1784_v41  ;;  %v801_v59 = vsel %vm1818_vm3, %v800_v1, %v796_v50  ;;  %v813_v57 = vadd.f32 %v1525_v24, %v812_v11  ;;  %v997_v41 = vmul.f32 %v1771_v32, %v1748_v17  ;;  %v1911_v32 = vld [vmem:[%s1726_s1 + $0x8] sm:$0xff] }
  0x41   : > { %v802_v63 = vmul.f32 %v801_v59, %v1786_v42  ;;  %v828_v2 = vadd.f32 %v1527_v16, %v827_v55  ;;  %v1901_v1 = vsub.f32 %v1809_v58, %v1804_v56  ;;  %vm2233_vm0 = vcmask 269312  }
  0x42   : > { %1528 = vlog2.f32 %v787_v61  ;;  %v817_v0 = vsel %vm1877_vm14, %v1525_v24, %v813_v57  ;;  %v1916_v33 = vadd.f32 %v997_v41, %v995_v62  ;;  %v1163_v56 = vsel %vm2233_vm0, %v1904_v7, 0.0 }
  0x43   : > { %1530 = vlog2.f32 %v802_v63  ;;  %v822_v42 = vsel %vm1830_vm8, %v821_v13, %v817_v0  ;;  %v832_v17 = vsel %vm1888_vm15, %v1527_v16, %v828_v2  ;;  %v1164_v6 = vsel %vm2233_vm0, %v1911_v32, 0.0 }
  0x44   : > { %v823_v8 = vmul.f32 %v822_v42, %v1789_v48  ;;  %v837_v18 = vsel %vm1835_vm9, %v836_v20, %v832_v17  ;;  %v1923_v9 = vsub.f32 %v858_v12, %v860_v34  ;;  %v1926_v13 = vand.u32 2147483647, %v1861_v37 }
  0x45   : > { %v838_v58 = vmul.f32 %v837_v18, %v1799_v54  ;;  %v1165_v48 = vadd.f32 %v1164_v6, %v1163_v56  ;;  %v1929_v14 = vand.u32 2147483647, %v1901_v1  ;;  %v1932_v15 = vand.u32 2147483647, %v1863_v45 }
  0x46   : > { %1532 = vlog2.f32 %v823_v8  ;;  %v1935_v19 = vand.u32 2147483647, %v1923_v9  ;;  %v1937_v54 = vsub.f32 %v989_v46, %v991_v47  ;;  %v1939_v21 = vadd.f32 %v998_v52, %v996_v5 }
  0x47   : > { %1534 = vlog2.f32 %v838_v58  ;;  %1166 = vadd.xlane.f32.xlu1 %v1165_v48  ;;  %v872_v22 = vmax.f32 %v1926_v13, %v1929_v14  ;;  %v1946_v12 = vand.u32 2147483647, %v1916_v33  ;;  %v1951_v16 = vsub.f32 %v990_v38, %v992_v60 }
  0x48   : > { %v1529_v20 = vpop.eup %1528  ;;  %v932_v26 = vmax.f32 %v1932_v15, %v1935_v19  ;;  %v1949_v27 = vand.u32 2147483647, %v1937_v54  ;;  %v1954_v31 = vand.u32 2147483647, %v1939_v21  ;;  %v871_v43 = vmin.f32 %v1926_v13, %v1929_v14 }
  0x49   : > { %v1531_v24 = vpop.eup %1530  ;;  %v804_v25 = vmul.f32 0.6931472, %v1529_v20  ;;  %1536 = vrcp.f32 %v872_v22  ;;  %v882_v35 = vand.u32 2147483647, %v872_v22  ;;  %v1961_v3 = vand.u32 2147483647, %v1951_v16 }
  0x4a   : > { %v806_v29 = vmul.f32 0.6931472, %v1531_v24  ;;  %1538 = vrcp.f32 %v932_v26  ;;  %v1958_v36 = vmax.f32 %v1946_v12, %v1949_v27  ;;  %v931_v44 = vmin.f32 %v1932_v15, %v1935_v19 }
  0x4b   : > { %v807_v23 = vmul.f32 4.3429446, %v804_v25  ;;  %vm878_vm1 = vweird.f32 %v872_v22  ;;  %v884_v11 = vand.u32 2147483648, %v872_v22  ;;  %v1970_v38 = vmax.f32 %v1954_v31, %v1961_v3 }
  0x4c   : > { %v1533_v30 = vpop.eup %1532  ;;  %v808_v39 = vmul.f32 4.3429446, %v806_v29  ;;  %1540 = vrcp.f32 %v1958_v36  ;;  %v942_v53 = vand.u32 2147483647, %v932_v26  ;;  %v944_v55 = vand.u32 2147483648, %v932_v26 }
  0x4d   : > { %v1535_v34 = vpop.eup %1534  ;;  %v840_v28 = vmul.f32 0.6931472, %v1533_v30  ;;  %vm1972_vm2 = vcmp.eq.f32.partialorder %v882_v35, 8.507059e+37  ;;  %vm938_vm3 = vweird.f32 %v932_v26  ;;  %1542 = vrcp.f32 %v1970_v38 }
  0x4e   : > { %v842_v40 = vmul.f32 0.6931472, %v1535_v34  ;;  %v885_v63 = vor.u32 1.1754944e-38, %v884_v11  ;;  %vm1978_vm6 = vcmp.eq.f32.partialorder %v942_v53, 8.507059e+37  ;;  %v945_v42 = vor.u32 1.1754944e-38, %v944_v55 }
  0x4f   : > { %v843_v10 = vmul.f32 4.3429446, %v840_v28  ;;  %v1537_v46 = vpop.eup %1536  ;;  %vm1010_vm8 = vweird.f32 %v1958_v36  ;;  %v1014_v20 = vand.u32 2147483647, %v1958_v36  ;;  %vm1070_vm13 = vweird.f32 %v1970_v38 }
  0x50   : > { %v844_v4 = vmul.f32 4.3429446, %v842_v40  ;;  %v1539_v47 = vpop.eup %1538  ;;  %v874_v50 = vmul.f32 %v1537_v46, %v872_v22  ;;  %vm879_vm4 = vweird.f32 %v1537_v46  ;;  %v1016_v22 = vand.u32 2147483648, %v1958_v36 }
  0x51   : > { %v845_v49 = vsub.f32 %v807_v23, %v843_v10  ;;  %v934_v59 = vmul.f32 %v1539_v47, %v932_v26  ;;  %vm939_vm5 = vweird.f32 %v1539_v47  ;;  %vm1984_vm7 = vmor %vm878_vm1, %vm879_vm4  ;;  %vm1015_vm12 = vcmp.eq.f32.partialorder %v1014_v20, 8.507059e+37 }
  0x52   : > { %v846_v60 = vsub.f32 %v808_v39, %v844_v4  ;;  %v875_v51 = vsub.f32 1.0, %v874_v50  ;;  %v1541_v5 = vpop.eup %1540  ;;  %vm1992_vm9 = vmor %vm938_vm3, %vm939_vm5  ;;  %v1076_v55 = vand.u32 2147483648, %v1970_v38  ;;  %vm917_vm3 = vcmp.ne.f32.partialorder %v1901_v1, %v1901_v1 }
  0x53   : > { %v847_v57 = vand.u32 2147483647, %v845_v49  ;;  %v935_v2 = vsub.f32 1.0, %v934_v59  ;;  %v1006_v56 = vmul.f32 %v1541_v5, %v1958_v36  ;;  %vm1011_vm10 = vweird.f32 %v1541_v5  ;;  %v1543_v30 = vpop.eup %1542 }
  0x54   : > { %v848_v62 = vand.u32 2147483647, %v846_v60  ;;  %v876_v0 = vmul.f32 %v1537_v46, %v875_v51  ;;  %v1066_v39 = vmul.f32 %v1543_v30, %v1970_v38  ;;  %vm2012_vm11 = vmor %vm1010_vm8, %vm1011_vm10  ;;  %vm1071_vm14 = vweird.f32 %v1543_v30 }
  0x55   : > { %v1126_v41 = vmul.f32 %v847_v57, %v1904_v7  ;;  %v936_v18 = vmul.f32 %v1539_v47, %v935_v2  ;;  %v1007_v29 = vsub.f32 1.0, %v1006_v56  ;;  %v1074_v59 = vand.u32 2147483647, %v1970_v38  ;;  %vm1072_vm15 = vmor %vm1070_vm13, %vm1071_vm14 }
  0x56   : > { %v1127_v17 = vmul.f32 %v848_v62, %v1911_v32  ;;  %v877_v6 = vadd.f32 %v1537_v46, %v876_v0  ;;  %v1063_v38 = vmin.f32 %v1954_v31, %v1961_v3  ;;  %vm922_vm5 = vcmp.eq.s32.totalorder %v1926_v13, inf }
  0x57   : > { %v1129_v58 = vsel %vm2233_vm0, %v1126_v41, 0.0  ;;  %v937_v25 = vadd.f32 %v1539_v47, %v936_v18  ;;  %v1008_v35 = vmul.f32 %v1541_v5, %v1007_v29  ;;  %v1077_v41 = vor.u32 1.1754944e-38, %v1076_v55 }
  0x58   : > { %v1130_v24 = vsel %vm2233_vm0, %v1127_v17, 0.0  ;;  %v881_v23 = vsel %vm1984_vm7, %v1537_v46, %v877_v6  ;;  %v1017_v46 = vor.u32 1.1754944e-38, %v1016_v22  ;;  %vm1075_vm1 = vcmp.eq.f32.partialorder %v1074_v59, 8.507059e+37 }
  0x59   : > { %v1131_v34 = vadd.f32 %v1130_v24, %v1129_v58  ;;  %v886_v26 = vsel %vm1972_vm2, %v885_v63, %v881_v23  ;;  %v941_v28 = vsel %vm1992_vm9, %v1539_v47, %v937_v25  ;;  %v1009_v49 = vadd.f32 %v1541_v5, %v1008_v35 }
  0x5a   : > { %v2006_v40 = vmul.f32 %v886_v26, %v871_v43  ;;  %v946_v10 = vsel %vm1978_vm6, %v945_v42, %v941_v28  ;;  %v1067_v47 = vsub.f32 1.0, %v1066_v39  ;;  %v1003_v43 = vmin.f32 %v1946_v12, %v1949_v27 }
  0x5b   : > { %1132 = vadd.xlane.f32.xlu0 %v1131_v34  ;;  %v2016_v11 = vmul.f32 %v946_v10, %v931_v44  ;;  %v1013_v44 = vsel %vm2012_vm11, %v1541_v5, %v1009_v49  ;;  %vm916_vm2 = vcmp.ne.f32.partialorder %v1861_v37, %v1861_v37  ;;  %vm923_vm6 = vcmp.eq.s32.totalorder %v1929_v14, inf }
  0x5c   : > { %v2020_v50 = vmul.f32 %v2006_v40, %v2006_v40  ;;  %v1068_v53 = vmul.f32 %v1543_v30, %v1067_v47  ;;  %v1018_v61 = vsel %vm1015_vm12, %v1017_v46, %v1013_v44  ;;  %vm2050_vm4 = vmor %vm916_vm2, %vm917_vm3  ;;  %vm976_vm8 = vcmp.ne.f32.partialorder %v1863_v45, %v1863_v45 }
  0x5d   : > { %v2027_v36 = vmul.f32 %v2016_v11, %v2016_v11  ;;  %v2035_v63 = vmul.f32 %v1018_v61, %v1003_v43  ;;  %vm2057_vm7 = vmand %vm922_vm5, %vm923_vm6  ;;  %vm977_vm9 = vcmp.ne.f32.partialorder %v1923_v9, %v1923_v9  ;;  %vm982_vm11 = vcmp.eq.s32.totalorder %v1932_v15, inf }
  0x5e   : > { %v889_v60 = vmul.f32 0.002785687, %v2020_v50  ;;  %v1069_v51 = vadd.f32 %v1543_v30, %v1068_v53  ;;  %vm2070_vm10 = vmor %vm976_vm8, %vm977_vm9  ;;  %vm983_vm12 = vcmp.eq.s32.totalorder %v1935_v19, inf  ;;  %vm1048_vm14 = vcmp.ne.f32.partialorder %v1916_v33, %v1916_v33 }
  0x5f   : > { %v949_v57 = vmul.f32 0.002785687, %v2027_v36  ;;  %v2041_v17 = vmul.f32 %v2035_v63, %v2035_v63  ;;  %vm2076_vm13 = vmand %vm982_vm11, %vm983_vm12  ;;  %vm1055_vm3 = vcmp.eq.s32.totalorder %v1949_v27, inf  ;;  %vm1108_vm6 = vcmp.ne.f32.partialorder %v1939_v21, %v1939_v21 }
  0x60   : > { %v890_v62 = vadd.f32 -0.015866, %v889_v60  ;;  %v1073_v5 = vsel %vm1072_vm15, %v1543_v30, %v1069_v51  ;;  %vm1049_vm15 = vcmp.ne.f32.partialorder %v1937_v54, %v1937_v54  ;;  %vm1109_vm8 = vcmp.ne.f32.partialorder %v1951_v16, %v1951_v16 }
  0x61   : > { %v950_v2 = vadd.f32 -0.015866, %v949_v57  ;;  %v1078_v18 = vsel %vm1075_vm1, %v1077_v41, %v1073_v5  ;;  %v1021_v22 = vmul.f32 0.002785687, %v2041_v17  ;;  %vm1054_vm1 = vcmp.eq.s32.totalorder %v1946_v12, inf  ;;  %vm2096_vm2 = vmor %vm1048_vm14, %vm1049_vm15 }
  0x62   : > { %v891_v0 = vmul.f32 %v890_v62, %v2020_v50  ;;  %v2062_v24 = vmul.f32 %v1078_v18, %v1063_v38  ;;  %vm2101_vm5 = vmand %vm1054_vm1, %vm1055_vm3  ;;  %vm1114_vm11 = vcmp.eq.s32.totalorder %v1954_v31, inf  ;;  %vm1115_vm12 = vcmp.eq.s32.totalorder %v1961_v3, inf }
  0x63   : > { %v951_v52 = vmul.f32 %v950_v2, %v2027_v36  ;;  %v1022_v28 = vadd.f32 -0.015866, %v1021_v22  ;;  %vm2116_vm9 = vmor %vm1108_vm6, %vm1109_vm8  ;;  %vm912_vm15 = vcmp.lt.s32.totalorder %v1861_v37, 0  ;;  %vm906_vm1 = vcmp.gt.f32.partialorder %v1929_v14, %v1926_v13 }
  0x64   : > { %v892_v42 = vadd.f32 0.04247222, %v891_v0  ;;  %v2082_v35 = vmul.f32 %v2062_v24, %v2062_v24  ;;  %vm2124_vm14 = vmand %vm1114_vm11, %vm1115_vm12  ;;  %vm909_vm3 = vcmp.lt.f32.partialorder %v1861_v37, 0.0  ;;  %vm966_vm6 = vcmp.gt.f32.partialorder %v1935_v19, %v1932_v15 }
  0x65   : > { %v952_v8 = vadd.f32 0.04247222, %v951_v52  ;;  %v1023_v4 = vmul.f32 %v1022_v28, %v2041_v17  ;;  %vm972_vm8 = vcmp.lt.s32.totalorder %v1863_v45, 0  ;;  %vm914_vm11 = vcmp.eq.f32.partialorder %v1901_v1, 0.0 }
  0x66   : > { %v893_v56 = vmul.f32 %v892_v42, %v2020_v50  ;;  %v1081_v49 = vmul.f32 0.002785687, %v2082_v35  ;;  %vm969_vm12 = vcmp.lt.f32.partialorder %v1863_v45, 0.0  ;;  %vm974_vm0 = vcmp.eq.f32.partialorder %v1923_v9, 0.0 }
  0x67   : > { %v953_v6 = vmul.f32 %v952_v8, %v2027_v36  ;;  %v1024_v43 = vadd.f32 0.04247222, %v1023_v4  ;;  %v1119_v62 = vand.u32 2147483648, %v1951_v16 }
  0x68   : > { %v894_v48 = vadd.f32 -0.074975304, %v893_v56  ;;  %v1082_v59 = vadd.f32 -0.015866, %v1081_v49 }
  0x69   : > { %v954_v25 = vadd.f32 -0.074975304, %v953_v6  ;;  %v1025_v55 = vmul.f32 %v1024_v43, %v2041_v17 }
  0x6a   : > { %v895_v29 = vmul.f32 %v894_v48, %v2020_v50  ;;  %v1083_v41 = vmul.f32 %v1082_v59, %v2082_v35 }
  0x6b   : > { %v955_v30 = vmul.f32 %v954_v25, %v2027_v36  ;;  %v1026_v51 = vadd.f32 -0.074975304, %v1025_v55 }
  0x6c   : > { %v896_v23 = vadd.f32 0.1064488, %v895_v29  ;;  %v1084_v42 = vadd.f32 0.04247222, %v1083_v41 }
  0x6d   : > { %v956_v39 = vadd.f32 0.1064488, %v955_v30  ;;  %v1027_v5 = vmul.f32 %v1026_v51, %v2041_v17  ;;  %v1586_v51 = vmov 0.7853982  }
  0x6e   : > { %v897_v10 = vmul.f32 %v896_v23, %v2020_v50  ;;  %v1085_v56 = vmul.f32 %v1084_v42, %v2082_v35 }
  0x6f   : > { %v957_v46 = vmul.f32 %v956_v39, %v2027_v36  ;;  %v1028_v8 = vadd.f32 0.1064488, %v1027_v5  ;;  %v981_v5 = vsel %vm969_vm12, 2.3561945, %v1586_v51 }
  0x70   : > { %v898_v47 = vadd.f32 -0.14207031, %v897_v10  ;;  %v1086_v29 = vadd.f32 -0.074975304, %v1085_v56 }
  0x71   : > { %v958_v44 = vadd.f32 -0.14207031, %v957_v46  ;;  %v1029_v48 = vmul.f32 %v1028_v8, %v2041_v17 }
  0x72   : > { %v899_v53 = vmul.f32 %v898_v47, %v2020_v50  ;;  %v1087_v39 = vmul.f32 %v1086_v29, %v2082_v35 }
  0x73   : > { %v959_v60 = vmul.f32 %v958_v44, %v2027_v36  ;;  %v1030_v23 = vadd.f32 -0.14207031, %v1029_v48 }
  0x74   : > { %v900_v57 = vadd.f32 0.19993454, %v899_v53  ;;  %v1088_v46 = vadd.f32 0.1064488, %v1087_v39 }
  0x75   : > { %v960_v2 = vadd.f32 0.19993454, %v959_v60 }
  0x76   : > { %v901_v0 = vmul.f32 %v900_v57, %v2020_v50  ;;  %v1089_v13 = vmul.f32 %v1088_v46, %v2082_v35 }
  0x77   : > { %v961_v52 = vmul.f32 %v960_v2, %v2027_v36  ;;  %v921_v2 = vsel %vm909_vm3, 2.3561945, %v1586_v51 }
  0x78   : > { %v902_v38 = vadd.f32 -0.33333147, %v901_v0  ;;  %v1090_v19 = vadd.f32 -0.14207031, %v1089_v13 }
  0x79   : > { %v962_v18 = vadd.f32 -0.33333147, %v961_v52 }
  0x7a   : > { %v903_v6 = vmul.f32 %v902_v38, %v2020_v50  ;;  %v1091_v45 = vmul.f32 %v1090_v19, %v2082_v35  ;;  %v927_v38 = vand.u32 2147483648, %v1901_v1 }
  0x7b   : > { %v963_v25 = vmul.f32 %v962_v18, %v2027_v36  ;;  %v1031_v36 = vmul.f32 %v1030_v23, %v2041_v17 }
  0x7c   : > { %v904_v30 = vmul.f32 %v903_v6, %v2006_v40  ;;  %v1092_v18 = vadd.f32 0.19993454, %v1091_v45  ;;  %v987_v6 = vand.u32 2147483648, %v1923_v9 }
  0x7d   : > { %v964_v50 = vmul.f32 %v963_v25, %v2016_v11  ;;  %v1032_v47 = vadd.f32 0.19993454, %v1031_v36 }
  0x7e   : > { %v905_v10 = vadd.f32 %v904_v30, %v2006_v40  ;;  %v1585_v40 = vmov 0.0   ;;  %v1093_v58 = vmul.f32 %v1092_v18, %v2082_v35 }
  0x7f   : > { %v965_v4 = vadd.f32 %v964_v50, %v2016_v11  ;;  %v913_v43 = vsel %vm912_vm15, 3.1415927, %v1585_v40  ;;  %v1033_v11 = vmul.f32 %v1032_v47, %v2041_v17  ;;  %v973_v15 = vsel %vm972_vm8, 3.1415927, %v1585_v40 }
  0x80   : > { %v907_v49 = vsub.f32 1.5707964, %v905_v10  ;;  %v1094_v20 = vadd.f32 -0.33333147, %v1093_v58  ;;  %vm1104_vm15 = vcmp.lt.s32.totalorder %v1939_v21, 0 }
  0x81   : > { %v967_v44 = vsub.f32 1.5707964, %v965_v4  ;;  %v1034_v59 = vadd.f32 -0.33333147, %v1033_v11 }
  0x82   : > { %v908_v14 = vsel %vm906_vm1, %v907_v49, %v905_v10  ;;  %v1095_v9 = vmul.f32 %v1094_v20, %v2082_v35  ;;  %vm1101_vm1 = vcmp.lt.f32.partialorder %v1939_v21, 0.0 }
  0x83   : > { %v910_v53 = vsub.f32 3.1415927, %v908_v14  ;;  %v968_v55 = vsel %vm966_vm6, %v967_v44, %v965_v4  ;;  %v1035_v52 = vmul.f32 %v1034_v59, %v2041_v17  ;;  %v1113_v61 = vsel %vm1101_vm1, 2.3561945, %v1586_v51 }
  0x84   : > { %v970_v60 = vsub.f32 3.1415927, %v968_v55 }
  0x85   : > { %v911_v57 = vsel %vm909_vm3, %v910_v53, %v908_v14  ;;  %v1036_v48 = vmul.f32 %v1035_v52, %v2035_v63  ;;  %vm1106_vm3 = vcmp.eq.f32.partialorder %v1951_v16, 0.0 }
  0x86   : > { %v915_v41 = vsel %vm914_vm11, %v913_v43, %v911_v57  ;;  %v971_v0 = vsel %vm969_vm12, %v970_v60, %v968_v55  ;;  %v1105_v43 = vsel %vm1104_vm15, 3.1415927, %v1585_v40 }
  0x87   : > { %v919_v42 = vsel %vm2050_vm4, nan, %v915_v41  ;;  %v975_v8 = vsel %vm974_vm0, %v973_v15, %v971_v0  ;;  %v1037_v1 = vadd.f32 %v1036_v48, %v2035_v63  ;;  %vm1038_vm0 = vcmp.gt.f32.partialorder %v1949_v27, %v1946_v12  ;;  %v1125_v0 = vld [vmem:[%s1683_s28] sm:$0x1] }
  0x88   : > { %v925_v37 = vsel %vm2057_vm7, %v921_v2, %v919_v42  ;;  %v979_v56 = vsel %vm2070_vm10, nan, %v975_v8  ;;  %vm1044_vm4 = vcmp.lt.s32.totalorder %v1916_v33, 0  ;;  %vm1041_vm7 = vcmp.lt.f32.partialorder %v1916_v33, 0.0 }
  0x89   : > { %v926_v25 = vand.u32 2147483647, %v925_v37  ;;  %v985_v17 = vsel %vm2076_vm13, %v981_v5, %v979_v56  ;;  %v1039_v23 = vsub.f32 1.5707964, %v1037_v1  ;;  %v1045_v39 = vsel %vm1044_vm4, 3.1415927, %v1585_v40 }
  0x8a   : > { %v986_v29 = vand.u32 2147483647, %v985_v17  ;;  %vm1046_vm10 = vcmp.eq.f32.partialorder %v1937_v54, 0.0  ;;  %v1096_v63 = vmul.f32 %v1095_v9, %v2062_v24  ;;  %v1053_v36 = vsel %vm1041_vm7, 2.3561945, %v1586_v51 }
  0x8b   : > { %v928_v30 = vor.u32 %v927_v38, %v926_v25  ;;  %v1040_v50 = vsel %vm1038_vm0, %v1039_v23, %v1037_v1  ;;  %vm1098_vm13 = vcmp.gt.f32.partialorder %v1961_v3, %v1954_v31  ;;  %v1059_v33 = vand.u32 2147483648, %v1937_v54  ;;  %v1144_v1 = vld [vmem:[%s1688_s13] sm:$0x1] }
  0x8c   : > { %v988_v34 = vor.u32 %v987_v6, %v986_v29  ;;  %v1042_v26 = vsub.f32 3.1415927, %v1040_v50  ;;  %v1097_v12 = vadd.f32 %v1096_v63, %v2062_v24 }
  0x8e   : > { %v1043_v10 = vsel %vm1041_vm7, %v1042_v26, %v1040_v50  ;;  %v1099_v4 = vsub.f32 1.5707964, %v1097_v12 }
  0x8f   : > { %v1047_v27 = vsel %vm1046_vm10, %v1045_v39, %v1043_v10 }
  0x90   : > { %v1051_v35 = vsel %vm2096_vm2, nan, %v1047_v27  ;;  %v1100_v47 = vsel %vm1098_vm13, %v1099_v4, %v1097_v12  ;;  %vm2291_vm2 = vcmask 269312  }
  0x91   : > { %v1057_v46 = vsel %vm2101_vm5, %v1053_v36, %v1051_v35  ;;  %v1102_v24 = vsub.f32 3.1415927, %v1100_v47  ;;  %vm2292_vm5 = vmmov %vm2291_vm2 }
  0x92   : > { %v1058_v49 = vand.u32 2147483647, %v1057_v46 }
  0x93   : > { %v1103_v3 = vsel %vm1101_vm1, %v1102_v24, %v1100_v47 }
  0x94   : > { %v1060_v31 = vor.u32 %v1059_v33, %v1058_v49  ;;  %v1107_v44 = vsel %vm1106_vm3, %v1105_v43, %v1103_v3 }
  0x95   : > { %v1111_v13 = vsel %vm2116_vm9, nan, %v1107_v44 }
  0x96   : > { %v1121_v54 = vsub.f32 %v928_v30, %v1060_v31  ;;  %v1117_v14 = vsel %vm2124_vm14, %v1113_v61, %v1111_v13  ;;  %v1162_v30 = vld [vmem:[%s1693_s23] sm:$0x1] }
  0x97   : > { %v1118_v11 = vand.u32 2147483647, %v1117_v14 }
  0x98   : > { %v1123_v21 = vand.u32 2147483647, %v1121_v54 }
  0x99   : > { %v1120_v53 = vor.u32 %v1119_v62, %v1118_v11 }
  0x9a   : > { %v1145_v40 = vmul.f32 %v1123_v21, %v1904_v7 }
  0x9b   : > { %v1122_v55 = vsub.f32 %v988_v34, %v1120_v53 }
  0x9c   : > { %v1147_v60 = vsel %vm2291_vm2, %v1145_v40, 0.0 }
  0x9d   : > { %v1124_v15 = vand.u32 2147483647, %v1122_v55 }
  0x9f   : > { %v1146_v19 = vmul.f32 %v1124_v15, %v1911_v32 }
  0xa1   : > { %v1148_v22 = vsel %vm2292_vm5, %v1146_v19, 0.0 }
  0xa2   : > { %v1149_v59 = vadd.f32 %v1148_v22, %v1147_v60 }
  0xa4   : > { %1150 = vadd.xlane.f32.xlu0 %v1149_v59 }
  0xba   : > { %v1167_v32 = vpop.xlane.xlu1 %1166 }
  0xbb   : > { %v1168_v52 = vrot.slane %v1167_v32, 4 }
  0xbd   : > { %v1169_v42 = vadd.f32 %v1168_v52, %v1167_v32 }
  0xbf   : > { %v1170_v38 = vrot.slane %v1169_v42, 2 }
  0xc1   : > { %v1171_v56 = vadd.f32 %v1170_v38, %v1169_v42 }
  0xc3   : > { %v1172_v25 = vrot.slane %v1171_v56, 1 }
  0xc5   : > { %v1173_v29 = vadd.f32 %v1172_v25, %v1171_v56 }
  0xce   : > { %v1133_v16 = vpop.xlane.xlu0 %1132 }
  0xcf   : > { %v1134_v28 = vrot.slane %v1133_v16, 4 }
  0xd1   : > { %v1135_v57 = vadd.f32 %v1134_v28, %v1133_v16 }
  0xd3   : > { %v1136_v51 = vrot.slane %v1135_v57, 2 }
  0xd5   : > { %v1137_v2 = vadd.f32 %v1136_v51, %v1135_v57 }
  0xd7   : > { %v1138_v45 = vrot.slane %v1137_v2, 1 }
  0xd9   : > { %v1139_v41 = vadd.f32 %v1138_v45, %v1137_v2 }
  0xdb   : > { %1471 = vpush %v1139_v41 }
 0x10c   : > { %s1472_s0 = spop %1471 }
 0x10d   : > { %v1141_v7 = vstv %s1472_s0 }
 0x10e   : > { %v1142_v5 = vadd.f32 %v1141_v7, %v1125_v0 }
 0x110   : > { %1143 = vst [vmem:[%s1683_s28] sm:$0x1] %v1142_v5 }
 0x117   : > { %v1151_v8 = vpop.xlane.xlu0 %1150 }
 0x118   : > { %v1152_v18 = vrot.slane %v1151_v8, 4 }
 0x11a   : > { %v1153_v37 = vadd.f32 %v1152_v18, %v1151_v8 }
 0x11c   : > { %v1154_v6 = vrot.slane %v1153_v37, 2 }
 0x11e   : > { %v1155_v48 = vadd.f32 %v1154_v6, %v1153_v37 }
 0x120   : > { %v1156_v17 = vrot.slane %v1155_v48, 1 }
 0x122   : > { %v1157_v58 = vadd.f32 %v1156_v17, %v1155_v48 }
 0x124   : > { %1473 = vpush %v1157_v58 }
 0x125   : > { %1475 = vpush %v1173_v29 }
 0x155   : > { %s1474_s1 = spop %1473 }
 0x156   : > { %v1159_v20 = vstv %s1474_s1  ;;  %s1476_s10 = spop %1475 }
 0x157   : > { %v1160_v34 = vadd.f32 %v1159_v20, %v1144_v1  ;;  %v1175_v23 = vstv %s1476_s10 }
 0x158   : > { %v1176_v9 = vadd.f32 %v1175_v23, %v1162_v30 }
 0x159   : > { %1161 = vst [vmem:[%s1688_s13] sm:$0x1] %v1160_v34 }
 0x15a   : > { %1177 = vst [vmem:[%s1693_s23] sm:$0x1] %v1176_v9 }
 0x15b PF: > { %s2293_s11 = sld [smem:[#allocation4_spill]] }
 0x15c   : > { %s2294_s17 = sld [smem:[#allocation2_spill]] }
 0x15d   : > { %s2295_s18 = sld [smem:[#allocation3_spill]] }
 0x15e   : > { %s2296_s19 = sld [smem:[#allocation5_spill]] }
 0x15f   : > { %s2297_s20 = sld [smem:[#allocation6_spill]] }
 0x161   : > { %s22_s21 = sadd.s32 1, %s2293_s11  }
 0x162   : > { %p19_p8 = scmp.ge.s32.totalorder %s22_s21, 6  }
 0x164   :  { %21 = sbr.rel (!%p19_p8) target bundleno = 6 (0x6), region = 138 }

</bundles_post_ra>
